<compile_context>
chip_gen: v5e
topology: v5e:2x2
jax: 0.10.0
libtpu: 0.0.40
codegen_flags: <defaults>
</compile_context>

<pallas_src>
import jax
import jax.numpy as jnp
from jax.experimental import pallas as pl
from jax.experimental.pallas import tpu as pltpu

LANE = 128  # TPU lane width


def _round_up(a: int, b: int) -> int:
    return (a + b - 1) // b * b


def _make_dqn_kernel(vpu_layer1: bool):
    def kernel(x_ref, w1_ref, b1_ref, w2_ref, b2_ref, w3_ref, b3_ref, o_ref):
        x = x_ref[...]                      # [TM, K]   f32
        w1 = w1_ref[...]                    # [K, 128]  f32

        # ---- layer 1 ----
        if vpu_layer1:
            # Tiny-K, tiny-batch latency regime: a static-unrolled chain of
            # broadcast FMAs on the VPU (all f32).
            h1 = x[:, 0:1] * w1[0:1, :]
            for k in range(1, x.shape[1]):              # static unroll, K small
                h1 = h1 + x[:, k:k + 1] * w1[k:k + 1, :]
        else:
            # Throughput regime: route layer 1 to the (otherwise idle) MXU so
            # the VALU slot only carries bias/ReLU/casts.  f32 operands — the
            # layer-1 FLOPs are negligible and this avoids any x cast at all.
            h1 = jnp.dot(x, w1, preferred_element_type=jnp.float32)
        h1 = jnp.maximum(h1 + b1_ref[...], 0.0)          # f32 VPU

        # ---- layer 2 (bf16 x bf16 -> f32 acc on the MXU) ----
        h2 = jnp.dot(h1.astype(jnp.bfloat16), w2_ref[...],
                     preferred_element_type=jnp.float32)
        h2 = jnp.maximum(h2 + b2_ref[...], 0.0)          # f32 VPU

        # ---- layer 3 (weights lane-padded to 128 for a clean MXU shape) ----
        out = jnp.dot(h2.astype(jnp.bfloat16), w3_ref[...],
                      preferred_element_type=jnp.float32)
        out = out + b3_ref[...]                          # [TM, n_pad] f32

        # Store only the real action columns into the unpadded output block.
        na = o_ref.shape[-1]
        if out.shape[-1] != na:
            out = out[:, :na]
        o_ref[...] = out.astype(o_ref.dtype)

    return kernel


def _choose_block_m(B: int) -> int:
    if B <= 256:
        # Latency regime: just the f32 sublane multiple — no wasted rows.
        return _round_up(max(B, 1), 8)
    # Throughput regime: fewest grid steps, but at least 2 balanced steps so
    # the v7x megacore annotation can split work; the 2048 cap keeps kernel
    # intermediates (~4-5 MiB) well inside even v5e's 16 MiB scoped default.
    return min(2048, _round_up(pl.cdiv(B, 2), 256))


def dqn_forward(x, params, *, block_m=None):
    """x: [B, n_observations] float32 -> [B, n_actions] float32."""
    w1, b1, w2, b2, w3, b3 = params
    B, n_obs = x.shape
    n_actions = w3.shape[1]

    if block_m is None:
        block_m = _choose_block_m(B)
    grid = (pl.cdiv(B, block_m),)

    # VPU layer-1 only in the tiny-K, tiny-batch latency regime; otherwise the
    # MXU takes it (item 5 of the perf review).
    vpu_layer1 = (n_obs <= 16) and (block_m <= 128)

    # Lane-pad layer-3 weights/bias to a multiple of 128 (matmul shape only —
    # the HBM output stays unpadded; the kernel slices at the store).
    n_pad = _round_up(max(n_actions, LANE), LANE)
    w3_p = jnp.pad(w3, ((0, 0), (0, n_pad - n_actions))).astype(jnp.bfloat16)
    b3_p = jnp.pad(b3, ((0, 0), (0, n_pad - n_actions)))
    w2_b = w2.astype(jnp.bfloat16)

    def resident(arr):
        # Same block index every grid step -> DMA'd once, stays VMEM-resident.
        return pl.BlockSpec(arr.shape, lambda i: (0, 0))

    out = pl.pallas_call(
        _make_dqn_kernel(vpu_layer1),
        out_shape=jax.ShapeDtypeStruct((B, n_actions), jnp.float32),
        grid_spec=pltpu.PrefetchScalarGridSpec(
            num_scalar_prefetch=0,
            grid=grid,
            in_specs=[
                pl.BlockSpec((block_m, n_obs), lambda i: (i, 0)),   # x tile (f32)
                resident(w1), resident(b1),
                resident(w2_b), resident(b2),
                resident(w3_p), resident(b3_p),
            ],
            out_specs=pl.BlockSpec((block_m, n_actions), lambda i: (i, 0)),
        ),
        compiler_params=pltpu.CompilerParams(
            dimension_semantics=("parallel",),   # v7x megacore batch sharding
        ),
    )(x, w1, b1, w2_b, b2, w3_p, b3_p)

    return out


def init_params(key, n_observations, n_actions, hidden=128):
    """Deterministic init mimicking nn.Linear's U(-1/sqrt(fan_in), 1/sqrt(fan_in))."""
    keys = jax.random.split(key, 6)

    def linear(kw, kb, fan_in, fan_out):
        bound = 1.0 / jnp.sqrt(jnp.float32(fan_in))
        w = jax.random.uniform(kw, (fan_in, fan_out), jnp.float32, -bound, bound)
        b = jax.random.uniform(kb, (1, fan_out), jnp.float32, -bound, bound)
        return w, b

    w1, b1 = linear(keys[0], keys[1], n_observations, hidden)
    w2, b2 = linear(keys[2], keys[3], hidden, hidden)
    w3, b3 = linear(keys[4], keys[5], hidden, n_actions)
    return (w1, b1, w2, b2, w3, b3)


def reference_forward(x, params):
    """Pure-f32 reference matching the PyTorch module."""
    w1, b1, w2, b2, w3, b3 = params
    h = jnp.maximum(x @ w1 + b1, 0.0)
    h = jnp.maximum(h @ w2 + b2, 0.0)
    return h @ w3 + b3


if __name__ == "__main__":
    key = jax.random.PRNGKey(0)

    def check(n_obs, n_act, batch, salt, tag):
        kp, kx = jax.random.split(jax.random.fold_in(key, salt))
        params = init_params(kp, n_obs, n_act)
        x = jax.random.normal(kx, (batch, n_obs), jnp.float32)
        out = jax.block_until_ready(dqn_forward(x, params))
        ref = reference_forward(x, params)
        assert out.shape == (batch, n_act), (tag, out.shape)
        # bf16 MXU operands for layers 2/3 (f32 accumulation) vs pure-f32 ref.
        err = float(jnp.max(jnp.abs(out - ref)))
        assert jnp.allclose(out, ref, atol=5e-2, rtol=5e-2), (tag, err)

    # CartPole-like tiny-batch inference: VPU layer-1, single 8-row block.
    check(n_obs=4, n_act=2, batch=2, salt=0, tag="latency")
    # Replay-buffer-sized batch: MXU layer-1 (tiny K), 2 balanced grid steps,
    # ragged masked last block, unpadded narrow output store.
    check(n_obs=4, n_act=2, batch=600, salt=1, tag="throughput")
    # Wider observation vector: MXU layer-1, single grid step.
    check(n_obs=32, n_act=6, batch=64, salt=2, tag="wide-obs")

    print("KERNEL_OK")
</pallas_src>

<mosaic_0001>
module attributes {stable_mosaic.version = 11 : i64} {
  func.func @kernel(%arg0: i32, %arg1: memref<8x4xf32, #tpu.memory_space<vmem>>, %arg2: memref<4x128xf32, #tpu.memory_space<vmem>>, %arg3: memref<1x128xf32, #tpu.memory_space<vmem>>, %arg4: memref<128x128xbf16, #tpu.memory_space<vmem>>, %arg5: memref<1x128xf32, #tpu.memory_space<vmem>>, %arg6: memref<128x128xbf16, #tpu.memory_space<vmem>>, %arg7: memref<1x128xf32, #tpu.memory_space<vmem>>, %arg8: memref<8x2xf32, #tpu.memory_space<vmem>>) attributes {dimension_semantics = [#tpu.dimension_semantics<parallel>], iteration_bounds = array<i64: 1>, scalar_prefetch = 0 : i64, scratch_operands = 0 : i64, tpu.core_type = #tpu.core_type<tc>, window_params = [{transform_indices = @transform_0, window_bounds = array<i64: 8, 4>}, {pipeline_mode = #tpu.pipeline_mode<synchronous>, transform_indices = @transform_1, window_bounds = array<i64: 4, 128>}, {pipeline_mode = #tpu.pipeline_mode<synchronous>, transform_indices = @transform_2, window_bounds = array<i64: 1, 128>}, {pipeline_mode = #tpu.pipeline_mode<synchronous>, transform_indices = @transform_3, window_bounds = array<i64: 128, 128>}, {pipeline_mode = #tpu.pipeline_mode<synchronous>, transform_indices = @transform_4, window_bounds = array<i64: 1, 128>}, {pipeline_mode = #tpu.pipeline_mode<synchronous>, transform_indices = @transform_5, window_bounds = array<i64: 128, 128>}, {pipeline_mode = #tpu.pipeline_mode<synchronous>, transform_indices = @transform_6, window_bounds = array<i64: 1, 128>}, {transform_indices = @transform_7, window_bounds = array<i64: 8, 2>}]} {
    %c0 = arith.constant 0 : index
    %c0_0 = arith.constant 0 : index
    %0 = vector.load %arg1[%c0, %c0_0] : memref<8x4xf32, #tpu.memory_space<vmem>>, vector<8x4xf32>
    %c0_1 = arith.constant 0 : index
    %c0_2 = arith.constant 0 : index
    %1 = vector.load %arg2[%c0_1, %c0_2] : memref<4x128xf32, #tpu.memory_space<vmem>>, vector<4x128xf32>
    %2 = vector.extract_strided_slice %0 {offsets = [0, 0], sizes = [8, 1], strides = [1, 1]} : vector<8x4xf32> to vector<8x1xf32>
    %3 = vector.extract_strided_slice %1 {offsets = [0, 0], sizes = [1, 128], strides = [1, 1]} : vector<4x128xf32> to vector<1x128xf32>
    %4 = vector.broadcast %2 : vector<8x1xf32> to vector<8x128xf32>
    %5 = vector.broadcast %3 : vector<1x128xf32> to vector<8x128xf32>
    %6 = arith.mulf %4, %5 : vector<8x128xf32>
    %7 = vector.extract_strided_slice %0 {offsets = [0, 1], sizes = [8, 1], strides = [1, 1]} : vector<8x4xf32> to vector<8x1xf32>
    %8 = vector.extract_strided_slice %1 {offsets = [1, 0], sizes = [1, 128], strides = [1, 1]} : vector<4x128xf32> to vector<1x128xf32>
    %9 = vector.broadcast %7 : vector<8x1xf32> to vector<8x128xf32>
    %10 = vector.broadcast %8 : vector<1x128xf32> to vector<8x128xf32>
    %11 = arith.mulf %9, %10 : vector<8x128xf32>
    %12 = arith.addf %6, %11 : vector<8x128xf32>
    %13 = vector.extract_strided_slice %0 {offsets = [0, 2], sizes = [8, 1], strides = [1, 1]} : vector<8x4xf32> to vector<8x1xf32>
    %14 = vector.extract_strided_slice %1 {offsets = [2, 0], sizes = [1, 128], strides = [1, 1]} : vector<4x128xf32> to vector<1x128xf32>
    %15 = vector.broadcast %13 : vector<8x1xf32> to vector<8x128xf32>
    %16 = vector.broadcast %14 : vector<1x128xf32> to vector<8x128xf32>
    %17 = arith.mulf %15, %16 : vector<8x128xf32>
    %18 = arith.addf %12, %17 : vector<8x128xf32>
    %19 = vector.extract_strided_slice %0 {offsets = [0, 3], sizes = [8, 1], strides = [1, 1]} : vector<8x4xf32> to vector<8x1xf32>
    %20 = vector.extract_strided_slice %1 {offsets = [3, 0], sizes = [1, 128], strides = [1, 1]} : vector<4x128xf32> to vector<1x128xf32>
    %21 = vector.broadcast %19 : vector<8x1xf32> to vector<8x128xf32>
    %22 = vector.broadcast %20 : vector<1x128xf32> to vector<8x128xf32>
    %23 = arith.mulf %21, %22 : vector<8x128xf32>
    %24 = arith.addf %18, %23 : vector<8x128xf32>
    %c0_3 = arith.constant 0 : index
    %c0_4 = arith.constant 0 : index
    %25 = vector.load %arg3[%c0_3, %c0_4] : memref<1x128xf32, #tpu.memory_space<vmem>>, vector<1x128xf32>
    %26 = vector.broadcast %25 : vector<1x128xf32> to vector<8x128xf32>
    %27 = arith.addf %24, %26 : vector<8x128xf32>
    %cst = arith.constant 0.000000e+00 : f32
    %28 = vector.broadcast %cst : f32 to vector<8x128xf32>
    %29 = arith.maximumf %27, %28 : vector<8x128xf32>
    %30 = arith.truncf %29 : vector<8x128xf32> to vector<8x128xbf16>
    %c0_5 = arith.constant 0 : index
    %c0_6 = arith.constant 0 : index
    %31 = vector.load %arg4[%c0_5, %c0_6] : memref<128x128xbf16, #tpu.memory_space<vmem>>, vector<128x128xbf16>
    %cst_7 = arith.constant dense<0.000000e+00> : vector<8x128xf32>
    %32 = tpu.matmul %30, %31, %cst_7 {dimension_numbers = #tpu.dot_dimension_numbers<[1], [0], [0], [1], [0, 0, 1, 1], [], []>} : vector<8x128xbf16>, vector<128x128xbf16>, vector<8x128xf32> -> vector<8x128xf32>
    %c0_8 = arith.constant 0 : index
    %c0_9 = arith.constant 0 : index
    %33 = vector.load %arg5[%c0_8, %c0_9] : memref<1x128xf32, #tpu.memory_space<vmem>>, vector<1x128xf32>
    %34 = vector.broadcast %33 : vector<1x128xf32> to vector<8x128xf32>
    %35 = arith.addf %32, %34 : vector<8x128xf32>
    %cst_10 = arith.constant 0.000000e+00 : f32
    %36 = vector.broadcast %cst_10 : f32 to vector<8x128xf32>
    %37 = arith.maximumf %35, %36 : vector<8x128xf32>
    %38 = arith.truncf %37 : vector<8x128xf32> to vector<8x128xbf16>
    %c0_11 = arith.constant 0 : index
    %c0_12 = arith.constant 0 : index
    %39 = vector.load %arg6[%c0_11, %c0_12] : memref<128x128xbf16, #tpu.memory_space<vmem>>, vector<128x128xbf16>
    %cst_13 = arith.constant dense<0.000000e+00> : vector<8x128xf32>
    %40 = tpu.matmul %38, %39, %cst_13 {dimension_numbers = #tpu.dot_dimension_numbers<[1], [0], [0], [1], [0, 0, 1, 1], [], []>} : vector<8x128xbf16>, vector<128x128xbf16>, vector<8x128xf32> -> vector<8x128xf32>
    %c0_14 = arith.constant 0 : index
    %c0_15 = arith.constant 0 : index
    %41 = vector.load %arg7[%c0_14, %c0_15] : memref<1x128xf32, #tpu.memory_space<vmem>>, vector<1x128xf32>
    %42 = vector.broadcast %41 : vector<1x128xf32> to vector<8x128xf32>
    %43 = arith.addf %40, %42 : vector<8x128xf32>
    %44 = vector.extract_strided_slice %43 {offsets = [0, 0], sizes = [8, 2], strides = [1, 1]} : vector<8x128xf32> to vector<8x2xf32>
    %c0_16 = arith.constant 0 : index
    %c0_17 = arith.constant 0 : index
    %45 = vector.load %arg8[%c0_16, %c0_17] : memref<8x2xf32, #tpu.memory_space<vmem>>, vector<8x2xf32>
    tpu.vector_store %arg8[%c0_16, %c0_17], %44 {strides = array<i32>} : memref<8x2xf32, #tpu.memory_space<vmem>>, vector<8x2xf32>,
    return
  }
  func.func @transform_0(%arg0: i32) -> (i32, i32) {
    %c0_i32 = arith.constant 0 : i32
    %c0_i32_0 = arith.constant 0 : i32
    return %arg0, %c0_i32 : i32, i32
  }
  func.func @transform_1(%arg0: i32) -> (i32, i32) {
    %c0_i32 = arith.constant 0 : i32
    %c0_i32_0 = arith.constant 0 : i32
    %c0_i32_1 = arith.constant 0 : i32
    return %c0_i32, %c0_i32_0 : i32, i32
  }
  func.func @transform_2(%arg0: i32) -> (i32, i32) {
    %c0_i32 = arith.constant 0 : i32
    %c0_i32_0 = arith.constant 0 : i32
    %c0_i32_1 = arith.constant 0 : i32
    return %c0_i32, %c0_i32_0 : i32, i32
  }
  func.func @transform_3(%arg0: i32) -> (i32, i32) {
    %c0_i32 = arith.constant 0 : i32
    %c0_i32_0 = arith.constant 0 : i32
    %c0_i32_1 = arith.constant 0 : i32
    return %c0_i32, %c0_i32_0 : i32, i32
  }
  func.func @transform_4(%arg0: i32) -> (i32, i32) {
    %c0_i32 = arith.constant 0 : i32
    %c0_i32_0 = arith.constant 0 : i32
    %c0_i32_1 = arith.constant 0 : i32
    return %c0_i32, %c0_i32_0 : i32, i32
  }
  func.func @transform_5(%arg0: i32) -> (i32, i32) {
    %c0_i32 = arith.constant 0 : i32
    %c0_i32_0 = arith.constant 0 : i32
    %c0_i32_1 = arith.constant 0 : i32
    return %c0_i32, %c0_i32_0 : i32, i32
  }
  func.func @transform_6(%arg0: i32) -> (i32, i32) {
    %c0_i32 = arith.constant 0 : i32
    %c0_i32_0 = arith.constant 0 : i32
    %c0_i32_1 = arith.constant 0 : i32
    return %c0_i32, %c0_i32_0 : i32, i32
  }
  func.func @transform_7(%arg0: i32) -> (i32, i32) {
    %c0_i32 = arith.constant 0 : i32
    %c0_i32_0 = arith.constant 0 : i32
    return %arg0, %c0_i32 : i32, i32
  }
}

</mosaic_0001>

<bundles_post_ra>
// kernel: tpu_custom_call.1
= control target key start
LH: loop header
LB: loop body
LE: loop exit
PB: predicated region body
PF: predicated region fallthrough
CT: control target
= control target key end

     0   :  { %12 = vsyncpa [#allocation3], 0  ;;  %s624_s0 = inlined_call_operand.hbm [shape: f32[2,4], index: 0, kind: input, shape index: {}]   ;;  %s625_s1 = inlined_call_operand.hbm [shape: f32[4,128], index: 1, kind: input, shape index: {}]   ;;  %s626_s2 = inlined_call_operand.vmem [shape: f32[1,128], index: 2, kind: input, shape index: {}]   ;;  %s627_s3 = inlined_call_operand.hbm [shape: bf16[128,128], index: 3, kind: input, shape index: {}]   ;;  %s628_s4 = inlined_call_operand.vmem [shape: f32[1,128], index: 4, kind: input, shape index: {}]   ;;  %s629_s5 = inlined_call_operand.hbm [shape: bf16[128,128], index: 5, kind: input, shape index: {}]   ;;  %s630_s6 = inlined_call_operand.vmem [shape: f32[1,128], index: 6, kind: input, shape index: {}]   ;;  %s631_s7 = inlined_call_operand.hbm [shape: f32[2,2], index: 7, kind: output, shape index: {}]  }
   0x1   :  { %13 = vsyncpa [#allocation6], 0 }
   0x2   :  { %14 = vsyncpa [#allocation9], 0 }
   0x3   :  { %15 = vsyncpa [#allocation4], 0  ;;  %s34_s26 = sshll.u32 %s625_s1, 4  ;;  %s35_s26 = int_to_ptr.hbm [resolvable:$true] %s34_s26 }
   0x4   :  { %19 = vsyncadd [#allocation3], 96  ;;  %s541_s27 = smov [#allocation5]   ;;  %s20_s8 = sshll.u32 %s624_s0, 4  ;;  %s21_s8 = int_to_ptr.hbm [resolvable:$true] %s20_s8 }
   0x5   :  { %s36_s28 = sshll.u32 %s541_s27, 4  ;;  %s542_s9 = smov [#allocation2]   ;;  %s37_s28 = int_to_ptr.vmem [resolvable:$true] %s36_s28 }
   0x6   :  { %39 = dma.hbm_to_vmem [thread:$0]  %s35_s26, 64, %s37_s28, [#allocation6]  }
   0x7   :  { %s22_s10 = sshll.u32 %s542_s9, 4  ;;  %s543_s11 = smov 32   ;;  %s23_s10 = int_to_ptr.vmem [resolvable:$true] %s22_s10 }
   0x8   :  { %s544_s12 = smov 2   ;;  %s46_s14 = sshll.u32 %s627_s3, 4  ;;  %s47_s14 = int_to_ptr.hbm [resolvable:$true] %s46_s14 }
   0x9   :  { %28 = dma.hbm_to_vmem [thread:$0]  %s21_s8, 32, %s23_s10, [#allocation3], %s543_s11, %s543_s11, %s544_s12  }
   0xa   :  { %s545_s15 = smov [#allocation7]   ;;  %s61_s18 = sshll.u32 %s629_s5, 4  ;;  %s62_s18 = int_to_ptr.hbm [resolvable:$true] %s61_s18 }
   0xb   :  { %s48_s16 = sshll.u32 %s545_s15, 4  ;;  %s546_s19 = smov 64   ;;  %s49_s16 = int_to_ptr.vmem [resolvable:$true] %s48_s16 }
   0xc   :  { %s547_s20 = smov 4   ;;  %s548_s21 = smov [#allocation8]  }
   0xd   :  { %54 = dma.hbm_to_vmem [thread:$0]  %s47_s14, 1024, %s49_s16, [#allocation6], %s546_s19, %s546_s19, %s547_s20  }
   0xe   :  { %s63_s22 = sshll.u32 %s548_s21, 4  ;;  %s64_s22 = int_to_ptr.vmem [resolvable:$true] %s63_s22 }
   0xf   :  { %69 = dma.hbm_to_vmem [thread:$0]  %s62_s18, 1024, %s64_s22, [#allocation9], %s546_s19, %s546_s19, %s547_s20  }
  0x10   :  { %533 = dma.done.wait [#allocation3], 128  }
  0x11   :  { %534 = vsyncadd [#allocation3], 4294967168 }
  0x12   :  { %535 = dma.done.wait [#allocation6], 1088  }
  0x13   :  { %536 = vsyncadd [#allocation6], 4294966208 }
  0x14   :  { %537 = dma.done.wait [#allocation9], 1024  }
  0x15   :  { %538 = vsyncadd [#allocation9], 4294966272  ;;  %v549_v0 = vmov 0   ;;  %v550_v1 = vmov 2   ;;  %v88_v2 = vld [vmem:[#allocation2] sm:$0xff]  ;;  %v551_v5 = vmov 1  }
  0x16   :  { %405 = vset.pattern.permute.xlu0 %v549_v0  ;;  %407 = vset.pattern.permute.xlu1 %v550_v1  ;;  %v383_v3 = vld [vmem:[#allocation7 + $0x38] sm:$0xff]  ;;  %v382_v4 = vld [vmem:[#allocation7 + $0x30] sm:$0xff]  ;;  %v552_v6 = vmov 3   ;;  %v381_v7 = vld [vmem:[#allocation7 + $0x28] sm:$0xff]  ;;  %vm289_vm0 = vcmask 15360  }
  0x17   :  { %92 = vperm.xlu0 %405, %v88_v2   ;;  %105 = vperm.xlu1 %407, %v88_v2   ;;  %v380_v8 = vld [vmem:[#allocation7 + $0x20] sm:$0xff]  ;;  %v379_v9 = vld [vmem:[#allocation7 + $0x18] sm:$0xff]  ;;  %v378_v10 = vld [vmem:[#allocation7 + $0x10] sm:$0xff] }
  0x18   :  { %193 = vmatpush.bf16.msra.mxu0 %v383_v3  ;;  %v377_v11 = vld [vmem:[#allocation7 + $0x8] sm:$0xff]  ;;  %v376_v12 = vld [vmem:[#allocation7] sm:$0xff]  ;;  %v391_v13 = vld [vmem:[#allocation8 + $0x38] sm:$0xff] }
  0x19   :  { %276 = vmatpush.bf16.msra.mxu1 %v391_v13  ;;  %v390_v14 = vld [vmem:[#allocation8 + $0x30] sm:$0xff]  ;;  %v389_v15 = vld [vmem:[#allocation8 + $0x28] sm:$0xff]  ;;  %v388_v18 = vld [vmem:[#allocation8 + $0x20] sm:$0xff] }
  0x1a   :  { %v89_v19 = vld [vmem:[#allocation5] sm:$0xf]  ;;  %v386_v29 = vld [vmem:[#allocation8 + $0x10] sm:$0xff]  ;;  %v385_v39 = vld [vmem:[#allocation8 + $0x8] sm:$0xff] }
  0x1b   :  { %v95_v20 = vperm.slane %v89_v19, 0  ;;  %v101_v21 = vperm.slane %v89_v19, 1  ;;  %v387_v22 = vld [vmem:[#allocation8 + $0x18] sm:$0xff]  ;;  %v108_v23 = vperm.slane %v89_v19, 2  ;;  %v115_v24 = vperm.slane %v89_v19, 3  ;;  %v384_v40 = vld [vmem:[#allocation8] sm:$0xff] }
  0x1c   :  { %194 = vmatpush.bf16.msra.mxu0 %v382_v4  ;;  %v410_v34 = vld [vmem:[%s626_s2] ss:$0 sm:$0xff] }
  0x1d   :  { %277 = vmatpush.bf16.msra.mxu1 %v390_v14  ;;  %v411_v41 = vld [vmem:[%s628_s4] ss:$0 sm:$0xff] }
  0x1e   :  { %v412_v47 = vld [vmem:[%s630_s6] ss:$0 sm:$0xff] }
  0x1f   :  { %406 = vset.pattern.permute.xlu0 %v551_v5  ;;  %408 = vset.pattern.permute.xlu1 %v552_v6 }
  0x20   :  { %98 = vperm.xlu0 %406, %v88_v2   ;;  %112 = vperm.xlu1 %408, %v88_v2  }
  0x21   :  { %195 = vmatpush.bf16.msra.mxu0 %v381_v7  ;;  %278 = vmatpush.bf16.msra.mxu1 %v389_v15 }
  0x25   :  { %196 = vmatpush.bf16.msra.mxu0 %v380_v8  ;;  %279 = vmatpush.bf16.msra.mxu1 %v388_v18 }
  0x28   :  { %409 = vset.pattern.permute.xlu0 %v552_v6 }
  0x29   :  { %197 = vmatpush.bf16.msra.mxu0 %v379_v9  ;;  %280 = vmatpush.bf16.msra.mxu1 %v387_v22 }
  0x2d   :  { %198 = vmatpush.bf16.msra.mxu0 %v378_v10  ;;  %281 = vmatpush.bf16.msra.mxu1 %v386_v29 }
  0x31   :  { %199 = vmatpush.bf16.msra.mxu0 %v377_v11  ;;  %282 = vmatpush.bf16.msra.mxu1 %v385_v39 }
  0x35   :  { %200 = vmatpush.bf16.msra.mxu0 %v376_v12  ;;  %283 = vmatpush.bf16.msra.mxu1 %v384_v40 }
  0x89   :  { %v93_v16 = vpop.permute.xlu0 %92  ;;  %v106_v17 = vpop.permute.xlu1 %105 }
  0x8a   :  { %v96_v27 = vmul.f32 %v95_v20, %v93_v16  ;;  %v109_v30 = vmul.f32 %v108_v23, %v106_v17 }
  0x92   :  { %v99_v25 = vpop.permute.xlu0 %98  ;;  %v113_v26 = vpop.permute.xlu1 %112 }
  0x93   :  { %v102_v28 = vmul.f32 %v101_v21, %v99_v25  ;;  %v116_v32 = vmul.f32 %v115_v24, %v113_v26 }
  0x95   :  { %v103_v31 = vadd.f32 %v102_v28, %v96_v27 }
  0x97   :  { %v110_v33 = vadd.f32 %v109_v30, %v103_v31 }
  0x99   :  { %v117_v35 = vadd.f32 %v116_v32, %v110_v33 }
  0x9b   :  { %v122_v36 = vadd.f32 %v410_v34, %v117_v35 }
  0x9d   :  { %v123_v37 = vmax.f32 %v122_v36, 0.0 }
  0x9f   :  { %v124_v38 = vpack.c.bf16 %v123_v37, %v123_v37 }
  0xa1   :  { %201 = vmatmul.bf16.vlgmr.msra.gmra.mxu0 %v124_v38 }
 0x11e   :  { %v202_v42 = vpop.f32.mrf.mxu0 }
 0x11f   :  { %v203_v43 = vadd.f32 %v411_v41, %v202_v42 }
 0x121   :  { %v206_v44 = vmax.f32 %v203_v43, 0.0 }
 0x123   :  { %v207_v45 = vpack.c.bf16 %v206_v44, %v206_v44 }
 0x125   :  { %284 = vmatmul.bf16.vlgmr.msra.gmra.mxu1 %v207_v45 }
 0x126   :  { %v204_v46 = vpop.f32.mrf.mxu0 }
 0x1a2   :  { %v285_v48 = vpop.f32.mrf.mxu1 }
 0x1a3   :  { %v286_v49 = vadd.f32 %v412_v47, %v285_v48 }
 0x1a5   :  { %290 = vst.msk [vmem:[#allocation10] sm:$0xff] %vm289_vm0, %v286_v49 }
 0x1aa   :  { %v287_v50 = vpop.f32.mrf.mxu1 }
 0x1ab   :  { %294 = vsyncadd [#allocation4], 96  ;;  %s297_s4 = sshll.u32 %s631_s7, 4  ;;  %s553_s28 = smov [#allocation10]   ;;  %s298_s4 = int_to_ptr.hbm [resolvable:$true] %s297_s4 }
 0x1ac   :  { %s295_s29 = sshll.u32 %s553_s28, 4  ;;  %s296_s29 = int_to_ptr.vmem [resolvable:$true] %s295_s29 }
 0x1ad   :  { %303 = dma.vmem_to_hbm [thread:$0]  %s296_s29, 32, %s298_s4, [#allocation4], %s543_s11, %s543_s11, %s544_s12  }
 0x1ae   :  { %539 = dma.done.wait [#allocation4], 128  }
 0x1af   :  { %540 = vsyncadd [#allocation4], 4294967168 }
 0x1b0   :  { %308 = vsyncpa [#allocation3], 1 }
 0x1b1   :  { %309 = vsyncpa [#allocation6], 1 }
 0x1b2   :  { %310 = vsyncpa [#allocation9], 1 }
 0x1b3   :  { %311 = vsyncpa [#allocation4], 1 }

</bundles_post_ra>
